<compile_context>
chip_gen: v7x
topology: tpu7x:2x2x1
jax: 0.10.0
libtpu: 0.0.40
codegen_flags: <defaults>
</compile_context>

<pallas_src>
import functools

import jax
import jax.numpy as jnp
import numpy as np
from jax.experimental import pallas as pl
from jax.experimental.pallas import tpu as pltpu

CHAR_EMB_SIZE = 50
FEATURE_MAPS = (40, 30, 30)
KERNELS = (1, 3, 5)
MAX_K = max(KERNELS)                 # 5 fused taps
MAX_PAD = MAX_K // 2                 # 2 zero rows of left conv padding per word
F_TOTAL = sum(FEATURE_MAPS)          # 100
F_PAD = 128                          # lane-dense output width
K_RAW = MAX_K * CHAR_EMB_SIZE        # 250: single fused MXU contraction
TAIL = 8                             # rows dropped per block by the window build
ROWS_PER_BLOCK = 6144                # ~15-25 MiB VMEM working set per grid step


def _round_up(v, m):
    return ((v + m - 1) // m) * m


def _char_cnn_kernel(x_ref, w_ref, b_ref, out_ref, *, tn, wpad, w_len):
    """One batch block.

    x_ref : (tn*wpad, 50) bf16  flattened zero-padded char embeddings
    w_ref : (250, 128)    bf16  fused conv weights (5 taps x 50 emb -> 100 fm + pad)
    b_ref : (1, 128)      f32   fused bias
    out   : (tn, 128)     f32
    """
    blk_rows = tn * wpad
    rows_w = blk_rows - TAIL          # multiple of 8; dropped rows are masked below
    # In-kernel im2col: five sublane-shifted views of the block, concatenated on
    # the lane axis into the fused K=250 slab (no HBM inflation, no wrapper pass).
    pieces = [x_ref[pl.ds(j, rows_w), :] for j in range(MAX_K)]
    slab = jnp.concatenate(pieces, axis=-1)                       # (rows_w, 250) bf16
    # Single fused MXU matmul, f32 accumulation.
    z = jnp.dot(slab, w_ref[...], preferred_element_type=jnp.float32)  # (rows_w, 128)
    # Pad back to an aligned row count, fold the per-word structure, mask the
    # invalid window positions (t >= word_len, includes all padding/tail rows).
    z = jnp.concatenate([z, jnp.zeros((TAIL, F_PAD), jnp.float32)], axis=0)
    z = z.reshape(tn, wpad, F_PAD)
    pos = jax.lax.broadcasted_iota(jnp.int32, (tn, wpad, 1), 1)
    z = jnp.where(pos < w_len, z, -jnp.inf)
    m = jnp.max(z, axis=1)                                        # (tn, 128)
    # tanh(max(z)+b) == max(tanh(z+b)) (both monotone): bias+tanh once per word.
    out_ref[...] = jnp.tanh(m + b_ref[...])


def _pack_params(weights, biases):
    """weights[i]: (k_i, 50, fm_i), biases[i]: (fm_i,) -> (250,128) bf16, (1,128) f32."""
    w_full = jnp.zeros((MAX_K, CHAR_EMB_SIZE, F_PAD), jnp.float32)
    b_full = jnp.zeros((1, F_PAD), jnp.float32)
    off = 0
    for w, b, k, fm in zip(weights, biases, KERNELS, FEATURE_MAPS):
        p = k // 2
        # tap j of a width-k conv (pad k//2) lands on fused tap (MAX_PAD - p + j)
        w_full = w_full.at[MAX_PAD - p:MAX_PAD - p + k, :, off:off + fm].set(
            w.astype(jnp.float32))
        b_full = b_full.at[0, off:off + fm].set(b.astype(jnp.float32))
        off += fm
    return w_full.reshape(K_RAW, F_PAD).astype(jnp.bfloat16), b_full


def _pick_tn(n, wpad):
    """Words per grid step: VMEM-bounded, and >=2 grid steps when batch allows."""
    tn_cap = max(8, (ROWS_PER_BLOCK // wpad) // 8 * 8)   # per-step row budget
    n8 = _round_up(max(n, 1), 8)
    half = _round_up((n8 + 1) // 2, 8)                   # aim for >= 2 steps (v7x megacore)
    return max(8, min(tn_cap, half))


def convolution_char_encoder(x, weights, biases):
    """x: [N, word_len, 50] f32 -> [N, sum(feature_maps)=100, 1] f32."""
    n, w_len, e = x.shape
    assert e == CHAR_EMB_SIZE
    w_fused, b_fused = _pack_params(weights, biases)

    # Per-word padded length: 2 zero rows in front (conv padding), zeros behind,
    # rounded so wpad - TAIL >= w_len (dropped block-tail rows are always masked)
    # and everything stays sublane aligned.
    wpad = _round_up(w_len, TAIL) + TAIL
    tn = _pick_tn(n, wpad)
    n_pad = _round_up(max(n, tn), tn)
    blk_rows = tn * wpad

    # The ONLY pre-kernel materialization: one fused bf16 cast + zero pad; the
    # reshape to the flat 2-D layout is metadata-only.
    x_flat = jnp.pad(
        x.astype(jnp.bfloat16),
        ((0, n_pad - n), (MAX_PAD, wpad - w_len - MAX_PAD), (0, 0)),
    ).reshape(n_pad * wpad, CHAR_EMB_SIZE)

    kernel = functools.partial(_char_cnn_kernel, tn=tn, wpad=wpad, w_len=w_len)
    out = pl.pallas_call(
        kernel,
        out_shape=jax.ShapeDtypeStruct((n_pad, F_PAD), jnp.float32),
        grid=(n_pad // tn,),
        in_specs=[
            pl.BlockSpec((blk_rows, CHAR_EMB_SIZE), lambda i: (i, 0)),
            pl.BlockSpec((K_RAW, F_PAD), lambda i: (0, 0)),   # VMEM-resident weight
            pl.BlockSpec((1, F_PAD), lambda i: (0, 0)),       # VMEM-resident bias
        ],
        out_specs=pl.BlockSpec((tn, F_PAD), lambda i: (i, 0)),
        compiler_params=pltpu.CompilerParams(
            dimension_semantics=("parallel",),                # megacore split on v7x
            vmem_limit_bytes=48 * 1024 * 1024,
        ),
    )(x_flat, w_fused, b_fused)
    return out[:n, :F_TOTAL][:, :, None]


def _reference(x, weights, biases):
    """Pure-JAX f32 reference of the PyTorch forward."""
    n, w_len, e = x.shape
    x_pad = jnp.pad(x, ((0, 0), (MAX_PAD, MAX_PAD), (0, 0)))
    feats = []
    for w, b, k in zip(weights, biases, KERNELS):
        p = k // 2
        acc = b[None, None, :]
        for j in range(k):
            start = MAX_PAD - p + j
            acc = acc + jnp.einsum("nwe,ef->nwf", x_pad[:, start:start + w_len, :], w[j])
        feats.append(jnp.max(jnp.tanh(acc), axis=1))
    return jnp.concatenate(feats, axis=1)[:, :, None]


if __name__ == "__main__":
    key = jax.random.PRNGKey(0)
    keys = jax.random.split(key, 1 + 2 * len(KERNELS))

    # Deterministic xavier-normal-style stand-in for fastNLP's initial_parameter.
    weights, biases = [], []
    for i, (fm, k) in enumerate(zip(FEATURE_MAPS, KERNELS)):
        std = (2.0 / (CHAR_EMB_SIZE * k * (1 + fm))) ** 0.5
        weights.append(std * jax.random.normal(
            keys[1 + 2 * i], (k, CHAR_EMB_SIZE, fm), jnp.float32))
        biases.append(0.01 * jax.random.normal(keys[2 + 2 * i], (fm,), jnp.float32))

    encoder = jax.jit(convolution_char_encoder)

    # (8, 16): tiny single-step case; (300, 12): exercises word-axis masking,
    # batch remainder padding and a 2-step ("parallel") grid.
    for n, w_len in ((8, 16), (300, 12)):
        x = jax.random.normal(jax.random.fold_in(keys[0], n),
                              (n, w_len, CHAR_EMB_SIZE), jnp.float32)
        out = jax.block_until_ready(encoder(x, weights, biases))
        ref = _reference(x, weights, biases)
        assert out.shape == (n, F_TOTAL, 1) and out.dtype == jnp.float32
        # tolerance absorbs the intentional bf16 input/weight cast (f32 MXU accum)
        np.testing.assert_allclose(np.asarray(out), np.asarray(ref),
                                   rtol=1e-2, atol=1e-2)
    print("KERNEL_OK")
</pallas_src>

<mosaic_0001>
module attributes {stable_mosaic.version = 11 : i64} {
  func.func @_char_cnn_kernel(%arg0: i32, %arg1: memref<192x50xbf16, #tpu.memory_space<vmem>>, %arg2: memref<250x128xbf16, #tpu.memory_space<vmem>>, %arg3: memref<1x128xf32, #tpu.memory_space<vmem>>, %arg4: memref<8x128xf32, #tpu.memory_space<vmem>>) attributes {dimension_semantics = [#tpu.dimension_semantics<parallel>], iteration_bounds = array<i64: 1>, scalar_prefetch = 0 : i64, scratch_operands = 0 : i64, tpu.core_type = #tpu.core_type<tc>, window_params = [{transform_indices = @transform_0, window_bounds = array<i64: 192, 50>}, {pipeline_mode = #tpu.pipeline_mode<synchronous>, transform_indices = @transform_1, window_bounds = array<i64: 250, 128>}, {pipeline_mode = #tpu.pipeline_mode<synchronous>, transform_indices = @transform_2, window_bounds = array<i64: 1, 128>}, {transform_indices = @transform_3, window_bounds = array<i64: 8, 128>}]} {
    %c0 = arith.constant 0 : index
    %c0_0 = arith.constant 0 : index
    %0 = vector.load %arg1[%c0, %c0_0] : memref<192x50xbf16, #tpu.memory_space<vmem>>, vector<184x50xbf16>
    %c1 = arith.constant 1 : index
    %c0_1 = arith.constant 0 : index
    %1 = vector.load %arg1[%c1, %c0_1] : memref<192x50xbf16, #tpu.memory_space<vmem>>, vector<184x50xbf16>
    %c2 = arith.constant 2 : index
    %c0_2 = arith.constant 0 : index
    %2 = vector.load %arg1[%c2, %c0_2] : memref<192x50xbf16, #tpu.memory_space<vmem>>, vector<184x50xbf16>
    %c3 = arith.constant 3 : index
    %c0_3 = arith.constant 0 : index
    %3 = vector.load %arg1[%c3, %c0_3] : memref<192x50xbf16, #tpu.memory_space<vmem>>, vector<184x50xbf16>
    %c4 = arith.constant 4 : index
    %c0_4 = arith.constant 0 : index
    %4 = vector.load %arg1[%c4, %c0_4] : memref<192x50xbf16, #tpu.memory_space<vmem>>, vector<184x50xbf16>
    %5 = tpu.concatenate %0, %1, %2, %3, %4 in 1 : vector<184x50xbf16>, vector<184x50xbf16>, vector<184x50xbf16>, vector<184x50xbf16>, vector<184x50xbf16> -> vector<184x250xbf16>
    %c0_5 = arith.constant 0 : index
    %c0_6 = arith.constant 0 : index
    %6 = vector.load %arg2[%c0_5, %c0_6] : memref<250x128xbf16, #tpu.memory_space<vmem>>, vector<250x128xbf16>
    %cst = arith.constant dense<0.000000e+00> : vector<184x128xf32>
    %7 = tpu.matmul %5, %6, %cst {dimension_numbers = #tpu.dot_dimension_numbers<[1], [0], [0], [1], [0, 0, 1, 1], [], []>} : vector<184x250xbf16>, vector<250x128xbf16>, vector<184x128xf32> -> vector<184x128xf32>
    %cst_7 = arith.constant 0.000000e+00 : f32
    %8 = vector.broadcast %cst_7 : f32 to vector<8x128xf32>
    %9 = tpu.concatenate %7, %8 in 0 : vector<184x128xf32>, vector<8x128xf32> -> vector<192x128xf32>
    %10 = vector.shape_cast %9 : vector<192x128xf32> to vector<8x24x128xf32>
    %11 = tpu.iota {dimensions = array<i32: 1>} : vector<8x24x1xi32>
    %c16_i32 = arith.constant 16 : i32
    %12 = vector.broadcast %c16_i32 : i32 to vector<8x24x1xi32>
    %13 = arith.cmpi slt, %11, %12 : vector<8x24x1xi32>
    %cst_8 = arith.constant 0xFF800000 : f32
    %14 = vector.shape_cast %13 : vector<8x24x1xi1> to vector<8x24x1xi1>
    %15 = vector.broadcast %14 : vector<8x24x1xi1> to vector<8x24x128xi1>
    %16 = vector.broadcast %cst_8 : f32 to vector<8x24x128xf32>
    %17 = arith.select %15, %10, %16 : vector<8x24x128xi1>, vector<8x24x128xf32>
    %cst_9 = arith.constant dense<0xFF800000> : vector<8x128xf32>
    %18 = vector.multi_reduction <maximumf>, %17, %cst_9 [1] : vector<8x24x128xf32> to vector<8x128xf32>
    %c0_10 = arith.constant 0 : index
    %c0_11 = arith.constant 0 : index
    %19 = vector.load %arg3[%c0_10, %c0_11] : memref<1x128xf32, #tpu.memory_space<vmem>>, vector<1x128xf32>
    %20 = vector.broadcast %19 : vector<1x128xf32> to vector<8x128xf32>
    %21 = arith.addf %18, %20 : vector<8x128xf32>
    %22 = math.tanh %21 : vector<8x128xf32>
    %c0_12 = arith.constant 0 : index
    %c0_13 = arith.constant 0 : index
    %23 = vector.load %arg4[%c0_12, %c0_13] : memref<8x128xf32, #tpu.memory_space<vmem>>, vector<8x128xf32>
    tpu.vector_store %arg4[%c0_12, %c0_13], %22 {strides = array<i32>} : memref<8x128xf32, #tpu.memory_space<vmem>>, vector<8x128xf32>,
    return
  }
  func.func @transform_0(%arg0: i32) -> (i32, i32) {
    %c0_i32 = arith.constant 0 : i32
    %c0_i32_0 = arith.constant 0 : i32
    return %arg0, %c0_i32 : i32, i32
  }
  func.func @transform_1(%arg0: i32) -> (i32, i32) {
    %c0_i32 = arith.constant 0 : i32
    %c0_i32_0 = arith.constant 0 : i32
    %c0_i32_1 = arith.constant 0 : i32
    return %c0_i32, %c0_i32_0 : i32, i32
  }
  func.func @transform_2(%arg0: i32) -> (i32, i32) {
    %c0_i32 = arith.constant 0 : i32
    %c0_i32_0 = arith.constant 0 : i32
    %c0_i32_1 = arith.constant 0 : i32
    return %c0_i32, %c0_i32_0 : i32, i32
  }
  func.func @transform_3(%arg0: i32) -> (i32, i32) {
    %c0_i32 = arith.constant 0 : i32
    %c0_i32_0 = arith.constant 0 : i32
    return %arg0, %c0_i32 : i32, i32
  }
}

</mosaic_0001>

<bundles_post_ra>
// kernel: convolution_char_encoder.1
= control target key start
LH: loop header
LB: loop body
LE: loop exit
PB: predicated region body
PF: predicated region fallthrough
CT: control target
= control target key end

     0   :  { %vm363_vm0 = vcmask 1045504   ;;  %vm227_vm1 = vcmask 1046528   ;;  %vm104_vm2 = vsmask.f32 7424  ;;  %s1205_s26 = smov 72   ;;  %s1206_s27 = smov 100   ;;  %s1727_s0 = inlined_call_operand.vmem [shape: bf16[192,50], index: 0, kind: input, shape index: {}]   ;;  %s1728_s1 = inlined_call_operand.vmem [shape: bf16[250,128], index: 1, kind: input, shape index: {}]   ;;  %s1729_s2 = inlined_call_operand.vmem [shape: f32[1,128], index: 2, kind: input, shape index: {}]   ;;  %s1730_s3 = inlined_call_operand.hbm [shape: f32[8,128], index: 3, kind: output, shape index: {}]  }
   0x1   :  { %v17_v0 = vld [vmem:[%s1727_s0 + $0x4] sm:$0xf]  ;;  %v42_v1 = vld [vmem:[%s1727_s0] sm:$0xc]  ;;  %v1239_v2 = vld [vmem:[%s1727_s0 + $0x8] sm:$0xff]   ;;  %s1207_s30 = smov 50  }
   0x2   :  { %v992_v3 = vcombine.low %v42_v1, %v17_v0  ;;  %v16_v4 = vld [vmem:[%s1727_s0] sm:$0xf]  ;;  %v1250_v6 = vld [vmem:[%s1727_s0 + $0x30] sm:$0xff]   ;;  %v365_v7 = vrot.slane %v1239_v2, 2  ;;  %v229_v10 = vrot.slane %v1239_v2, 1  ;;  %v1259_v12 = vld [vmem:[%s1727_s0 + $0x38] sm:$0xff]  }
   0x3   :  { %v40_v5 = vld [vmem:[%s1727_s0] sm:$0xe]  ;;  %v1253_v8 = vcombine.low %v16_v4, %v17_v0  ;;  %v239_v14 = vrot.slane %v1250_v6, 1  ;;  %v241_v17 = vrot.slane %v1259_v12, 1  ;;  %v113_v19 = vshll.u32 %v1239_v2, 16  ;;  %v1289_v39 = vld [vmem:[%s1727_s0 + $0x10] sm:$0xff]  }
   0x4   :  { %v990_v9 = vcombine.low %v40_v5, %v17_v0  ;;  %v364_v11 = vrot.slane %v992_v3, 2  ;;  %v117_v21 = vshrl.u32 %v1239_v2, 16  ;;  %vm278_vm3 = vsmask.f32 6400  ;;  %v1305_v51 = vld [vmem:[%s1727_s0 + $0x40] sm:$0xff]   ;;  %s1208_s6 = smov 22  }
   0x5   :  { %v106_v15 = vshrl.u32 %v1253_v8, 16  ;;  %v108_v18 = vshll.u32 %v1253_v8, 16  ;;  %v242_v23 = vsel %vm227_vm1, %v239_v14, %v241_v17  ;;  %v115_v25 = vrot.slane %v113_v19, 1  ;;  %v1148_v60 = vld [vmem:[%s1728_s1 + $0x40] sm:$0xff]   ;;  %v1150_v3 = vld [vmem:[%s1728_s1 + $0x48] sm:$0xff]  }
   0x6   :  { %v228_v13 = vrot.slane %v990_v9, 1  ;;  %v366_v16 = vsel %vm363_vm0, %v364_v11, %v365_v7  ;;  %v280_v22 = vshrl.u32 %v990_v9, 16  ;;  %v283_v26 = vshll.u32 %v990_v9, 16  ;;  %v1149_v61 = vld [vmem:[%s1728_s1] sm:$0xff]   ;;  %1022 = vmatprep.subr.bf16.mxu0 %v1148_v60  ;;  %1110 = vmatprep.subr.bf16.mxu1 %v1148_v60  ;;  %v1151_v4 = vld [vmem:[%s1728_s1 + $0x8] sm:$0xff]  }
   0x7   :  { %387 = vrot.lane.b32.xlu1 %v366_v16, %s1205_s26  ;;  %v110_v24 = vrot.slane %v108_v18, 1  ;;  %v287_v28 = vrot.slane %v117_v21, 1  ;;  %v288_v29 = vrot.slane %v113_v19, 2  ;;  %v153_v30 = vshll.u32 %v1250_v6, 16  ;;  %1023 = vmatpush3.bf16.msra.mxu0 %v1149_v61  ;;  %v1361_v19 = vld [vmem:[%s1727_s0 + $0x18] sm:$0xff]  }
   0x8   :  { %v230_v20 = vsel %vm227_vm1, %v228_v13, %v229_v10  ;;  %v282_v27 = vrot.slane %v280_v22, 1  ;;  %v285_v32 = vrot.slane %v283_v26, 2  ;;  %v157_v33 = vshrl.u32 %v1250_v6, 16  ;;  %1118 = vmatpush3.bf16.msra.mxu1 %v1149_v61  ;;  %1024 = vmatprep.subr.bf16.mxu0 %v1150_v3  ;;  %v1152_v13 = vld [vmem:[%s1728_s1 + $0x50] sm:$0xff]   ;;  %v1159_v61 = vld [vmem:[%s1728_s1 + $0x28] sm:$0xff]  }
   0x9   :  { %251 = vrot.lane.b32.xlu0 %v230_v20, %s1206_s27  ;;  %v111_v31 = vor.u32 %v110_v24, %v106_v15  ;;  %v161_v34 = vshll.u32 %v1259_v12, 16  ;;  %v289_v35 = vor.u32 %v288_v29, %v287_v28  ;;  %v165_v36 = vshrl.u32 %v1259_v12, 16  ;;  %1111 = vmatprep.subr.bf16.mxu1 %v1150_v3  ;;  %v1153_v20 = vld [vmem:[%s1728_s1 + $0x10] sm:$0xff]   ;;  %v1387_v28 = vld [vmem:[%s1727_s0 + $0x48] sm:$0xff]  }
   0xa   :  { %v308_v37 = vrot.slane %v153_v30, 2  ;;  %v1284_v38 = vrot.slane %v153_v30, 1  ;;  %v286_v41 = vor.u32 %v285_v32, %v282_v27  ;;  %v307_v42 = vrot.slane %v157_v33, 1 }
   0xb   :  { %v116_v40 = vsel %vm104_vm2, %v111_v31, %v115_v25  ;;  %v312_v43 = vrot.slane %v161_v34, 2  ;;  %v311_v44 = vrot.slane %v165_v36, 1  ;;  %v163_v46 = vrot.slane %v161_v34, 1  ;;  %1025 = vmatpush3.bf16.msra.mxu0 %v1151_v4  ;;  %v1155_v31 = vld [vmem:[%s1728_s1 + $0x18] sm:$0xff]  }
   0xc   :  { %200 = vrot.lane.b32.xlu1 %v116_v40, %s1207_s30  ;;  %v159_v45 = vor.u32 %v157_v33, %v1284_v38  ;;  %v290_v47 = vsel %vm278_vm3, %v286_v41, %v289_v35  ;;  %v1298_v48 = vor.u32 %v308_v37, %v307_v42  ;;  %v375_v49 = vrot.slane %v1250_v6, 2  ;;  %1119 = vmatpush3.bf16.msra.mxu1 %v1151_v4  ;;  %v1406_v33 = vld [vmem:[%s1727_s0 + $0x28] sm:$0xff]   ;;  %v1157_v41 = vld [vmem:[%s1728_s1 + $0x20] sm:$0xff]  }
   0xd   :  { %263 = vrot.lane.b32.xlu0 %v242_v23, %s1206_s27  ;;  %v377_v50 = vrot.slane %v1259_v12, 2  ;;  %v1307_v52 = vor.u32 %v312_v43, %v311_v44  ;;  %v121_v53 = vshll.u32 %v1289_v39, 16  ;;  %v125_v54 = vshrl.u32 %v1289_v39, 16  ;;  %1026 = vmatprep.subr.bf16.mxu0 %v1152_v13  ;;  %v1154_v23 = vld [vmem:[%s1728_s1 + $0x58] sm:$0xff]  }
   0xe   :  { %v231_v55 = vrot.slane %v1289_v39, 1  ;;  %v164_v57 = vsel %vm104_vm2, %v159_v45, %v163_v46  ;;  %v169_v0 = vshll.u32 %v1305_v51, 16  ;;  %v173_v1 = vshrl.u32 %v1305_v51, 16  ;;  %1112 = vmatprep.subr.bf16.mxu1 %v1152_v13 }
   0xf   :  { %v314_v56 = vsel %vm278_vm3, %v1298_v48, %v1307_v52  ;;  %v291_v58 = vrot.slane %v125_v54, 1  ;;  %v292_v59 = vrot.slane %v121_v53, 2  ;;  %v378_v62 = vsel %vm363_vm0, %v375_v49, %v377_v50  ;;  %1027 = vmatpush3.bf16.msra.mxu0 %v1153_v20 }
  0x10   :  { %348 = vrot.lane.b32.xlu1 %v314_v56, %s1208_s6  ;;  %v232_v5 = vsel %vm227_vm1, %v229_v10, %v231_v55  ;;  %v119_v9 = vor.u32 %v117_v21, %v115_v25  ;;  %v1347_v11 = vrot.slane %v121_v53, 1  ;;  %v367_v16 = vrot.slane %v1289_v39, 2  ;;  %1120 = vmatpush3.bf16.msra.mxu1 %v1153_v20  ;;  %v1442_v53 = vld [vmem:[%s1727_s0 + $0x20] sm:$0xff]  }
  0x11   :  { %336 = vrot.lane.b32.xlu0 %v290_v47, %s1208_s6  ;;  %v1331_v63 = vor.u32 %v292_v59, %v291_v58  ;;  %v315_v10 = vrot.slane %v173_v1, 1  ;;  %v316_v18 = vrot.slane %v169_v0, 2  ;;  %v243_v22 = vrot.slane %v1305_v51, 1  ;;  %1028 = vmatprep.subr.bf16.mxu0 %v1154_v23 }
  0x12   :  { %v124_v21 = vsel %vm104_vm2, %v119_v9, %v1347_v11  ;;  %v368_v24 = vsel %vm363_vm0, %v365_v7, %v367_v16  ;;  %v129_v26 = vshll.u32 %v1361_v19, 16  ;;  %v133_v27 = vshrl.u32 %v1361_v19, 16  ;;  %1113 = vmatprep.subr.bf16.mxu1 %v1154_v23 }
  0x13   :  { %v294_v15 = vsel %vm278_vm3, %v289_v35, %v1331_v63  ;;  %v1379_v25 = vor.u32 %v316_v18, %v315_v10  ;;  %v244_v7 = vsel %vm227_vm1, %v241_v17, %v243_v22  ;;  %v167_v29 = vor.u32 %v165_v36, %v163_v46  ;;  %v1156_v17 = vld [vmem:[%s1728_s1 + $0x60] sm:$0xff]   ;;  %1029 = vmatpush3.bf16.msra.mxu0 %v1155_v31 }
  0x14   :  { %399 = vrot.lane.b32.xlu1 %v378_v62, %s1205_s26  ;;  %v1396_v30 = vrot.slane %v169_v0, 1  ;;  %v379_v32 = vrot.slane %v1305_v51, 2  ;;  %v295_v35 = vrot.slane %v133_v27, 1  ;;  %v296_v36 = vrot.slane %v129_v26, 2  ;;  %1121 = vmatpush3.bf16.msra.mxu1 %v1155_v31 }
  0x15   :  { %212 = vrot.lane.b32.xlu0 %v164_v57, %s1207_s30  ;;  %v318_v34 = vsel %vm278_vm3, %v1307_v52, %v1379_v25  ;;  %v233_v40 = vrot.slane %v1361_v19, 1  ;;  %v177_v42 = vshll.u32 %v1387_v28, 16  ;;  %v145_v43 = vshll.u32 %v1406_v33, 16  ;;  %1030 = vmatprep.subr.bf16.mxu0 %v1156_v17  ;;  %v1158_v52 = vld [vmem:[%s1728_s1 + $0x68] sm:$0xff]  }
  0x16   :  { %v172_v37 = vsel %vm104_vm2, %v167_v29, %v1396_v30  ;;  %v149_v44 = vshrl.u32 %v1406_v33, 16  ;;  %v380_v45 = vsel %vm363_vm0, %v377_v50, %v379_v32  ;;  %v1432_v46 = vor.u32 %v296_v36, %v295_v35  ;;  %1114 = vmatprep.subr.bf16.mxu1 %v1156_v17 }
  0x17   :  { %v181_v47 = vshrl.u32 %v1387_v28, 16  ;;  %v237_v56 = vrot.slane %v1406_v33, 1  ;;  %v304_v50 = vrot.slane %v145_v43, 2  ;;  %v234_v58 = vsel %vm227_vm1, %v231_v55, %v233_v40  ;;  %1031 = vmatpush3.bf16.msra.mxu0 %v1157_v41  ;;  %v1160_v55 = vld [vmem:[%s1728_s1 + $0x70] sm:$0xff]  }
  0x18   :  { %338 = vrot.lane.b32.xlu1 %v294_v15, %s1208_s6  ;;  %v303_v57 = vrot.slane %v149_v44, 1  ;;  %v127_v59 = vor.u32 %v125_v54, %v1347_v11  ;;  %v1453_v60 = vrot.slane %v129_v26, 1  ;;  %1122 = vmatpush3.bf16.msra.mxu1 %v1157_v41  ;;  %v369_v62 = vrot.slane %v1361_v19, 2 }
  0x19   :  { %253 = vrot.lane.b32.xlu0 %v232_v5, %s1206_s27  ;;  %v1467_v54 = vsel %vm227_vm1, %v237_v56, %v239_v14  ;;  %v298_v3 = vsel %vm278_vm3, %v1331_v63, %v1432_v46  ;;  %v319_v4 = vrot.slane %v181_v47, 1  ;;  %v320_v5 = vrot.slane %v177_v42, 2  ;;  %1032 = vmatprep.subr.bf16.mxu0 %v1158_v52 }
  0x1a   :  { %v1460_v0 = vor.u32 %v304_v50, %v303_v57  ;;  %v1477_v9 = vrot.slane %v145_v43, 1  ;;  %1115 = vmatprep.subr.bf16.mxu1 %v1158_v52  ;;  %v373_v14 = vrot.slane %v1406_v33, 2 }
  0x1c   :  { %389 = vrot.lane.b32.xlu1 %v368_v24, %s1205_s26  ;;  %v1484_v11 = vsel %vm278_vm3, %v1460_v0, %v1298_v48 }
  0x1d   :  { %202 = vrot.lane.b32.xlu0 %v124_v21, %s1207_s30 }
  0x20   :  { %350 = vrot.lane.b32.xlu1 %v318_v34, %s1208_s6 }
  0x21   :  { %265 = vrot.lane.b32.xlu0 %v244_v7, %s1206_s27 }
  0x24   :  { %401 = vrot.lane.b32.xlu1 %v380_v45, %s1205_s26 }
  0x25   :  { %214 = vrot.lane.b32.xlu0 %v172_v37, %s1207_s30 }
  0x29   :  { %255 = vrot.lane.b32.xlu0 %v234_v58, %s1206_s27 }
  0x2a   :  { %8 = vsyncpa [#allocation3], 0  ;;  %v132_v63 = vsel %vm104_vm2, %v127_v59, %v1453_v60  ;;  %v245_v13 = vrot.slane %v1387_v28, 1  ;;  %v151_v15 = vor.u32 %v149_v44, %v1477_v9  ;;  %1033 = vmatpush3.bf16.msra.mxu0 %v1159_v61  ;;  %1123 = vmatpush3.bf16.msra.mxu1 %v1159_v61  ;;  %v1161_v10 = vld [vmem:[%s1728_s1 + $0x30] sm:$0xff]   ;;  %v370_v48 = vsel %vm363_vm0, %v367_v16, %v369_v62  ;;  %v1162_v21 = vld [vmem:[%s1728_s1 + $0x78] sm:$0x1f]  }
  0x2b   :  { %340 = vrot.lane.b32.xlu1 %v298_v3, %s1208_s6  ;;  %v137_v18 = vshll.u32 %v1442_v53, 16  ;;  %v1505_v20 = vsel %vm363_vm0, %v373_v14, %v375_v49  ;;  %1034 = vmatprep.subr.bf16.mxu0 %v1160_v55  ;;  %v321_v23 = vor.u32 %v320_v5, %v319_v4  ;;  %v141_v24 = vshrl.u32 %v1442_v53, 16  ;;  %v41_v58 = vld [vmem:[%s1727_s0 + $0x5c] sm:$0x3] }
  0x2c   :  { %v1513_v16 = vsel %vm104_vm2, %v151_v15, %v1284_v38  ;;  %1116 = vmatprep.subr.bf16.mxu1 %v1160_v55  ;;  %vm676_vm4 = vcmask 1044480   ;;  %v246_v49 = vsel %vm227_vm1, %v243_v22, %v245_v13  ;;  %v175_v26 = vor.u32 %v173_v1, %v1396_v30  ;;  %v1163_v38 = vld [vmem:[%s1728_s1 + $0x38] sm:$0xff]   ;;  %v1534_v1 = vld [vmem:[%s1727_s0 + $0x50] sm:$0xff]  }
  0x2d   :  { %204 = vrot.lane.b32.xlu0 %v132_v63, %s1207_s30  ;;  %v179_v7 = vrot.slane %v177_v42, 1  ;;  %v322_v29 = vsel %vm278_vm3, %v1379_v25, %v321_v23  ;;  %v381_v31 = vrot.slane %v1387_v28, 2  ;;  %v299_v22 = vrot.slane %v141_v24, 1  ;;  %v39_v5 = vld [vmem:[%s1727_s0 + $0x5c] sm:$0x1] }
  0x2e   :  { %1035 = vmatpush3.bf16.msra.mxu0 %v1161_v10  ;;  %1124 = vmatpush3.bf16.msra.mxu1 %v1161_v10  ;;  %v300_v17 = vrot.slane %v137_v18, 2  ;;  %v235_v34 = vrot.slane %v1442_v53, 1  ;;  %v185_v36 = vshll.u32 %v1534_v1, 16  ;;  %v189_v37 = vshrl.u32 %v1534_v1, 16 }
  0x2f   :  { %391 = vrot.lane.b32.xlu1 %v370_v48, %s1205_s26  ;;  %1126 = vmatprep.subr.msk.bf16.mxu0 %vm676_vm4, %v1162_v21  ;;  %v180_v30 = vsel %vm104_vm2, %v175_v26, %v179_v7  ;;  %v382_v25 = vsel %vm363_vm0, %v379_v32, %v381_v31  ;;  %v135_v42 = vor.u32 %v133_v27, %v1453_v60  ;;  %v139_v43 = vrot.slane %v137_v18, 1 }
  0x30   :  { %1127 = vmatprep.subr.msk.bf16.mxu1 %vm676_vm4, %v1162_v21  ;;  %v301_v35 = vor.u32 %v300_v17, %v299_v22  ;;  %v236_v41 = vsel %vm227_vm1, %v233_v40, %v235_v34  ;;  %v371_v44 = vrot.slane %v1442_v53, 2  ;;  %v323_v45 = vrot.slane %v189_v37, 1 }
  0x31   :  { %267 = vrot.lane.b32.xlu0 %v246_v49, %s1206_s27  ;;  %v324_v52 = vrot.slane %v185_v36, 2  ;;  %v140_v57 = vsel %vm104_vm2, %v135_v42, %v139_v43  ;;  %v247_v40 = vrot.slane %v1534_v1, 1  ;;  %v183_v60 = vor.u32 %v181_v47, %v179_v7 }
  0x32   :  { %1037 = vmatpush3.bf16.msra.mxu0 %v1163_v38  ;;  %1125 = vmatpush3.bf16.msra.mxu1 %v1163_v38  ;;  %v302_v32 = vsel %vm278_vm3, %v1432_v46, %v301_v35  ;;  %v372_v27 = vsel %vm363_vm0, %v369_v62, %v371_v44  ;;  %v1567_v46 = vld [vmem:[%s1727_s0 + $0x58] sm:$0xf]  ;;  %v187_v61 = vrot.slane %v185_v36, 1  ;;  %v383_v55 = vrot.slane %v1534_v1, 2 }
  0x33   :  { %352 = vrot.lane.b32.xlu1 %v322_v29, %s1208_s6  ;;  %v325_v50 = vor.u32 %v324_v52, %v323_v45  ;;  %v248_v59 = vsel %vm227_vm1, %v245_v13, %v247_v40  ;;  %v991_v3 = vcombine.low %v1567_v46, %v41_v58  ;;  %v238_v15 = vsel %vm227_vm1, %v235_v34, %v237_v56 }
  0x34   :  { %v188_v4 = vsel %vm104_vm2, %v183_v60, %v187_v61  ;;  %v384_v47 = vsel %vm363_vm0, %v381_v31, %v383_v55  ;;  %v143_v10 = vor.u32 %v141_v24, %v139_v43  ;;  %v989_v48 = vcombine.low %v1567_v46, %v39_v5 }
  0x35   :  { %216 = vrot.lane.b32.xlu0 %v180_v30, %s1207_s30  ;;  %v326_v62 = vsel %vm278_vm3, %v321_v23, %v325_v50  ;;  %v328_v63 = vshrl.u32 %v991_v3, 16  ;;  %v331_v13 = vshll.u32 %v991_v3, 16  ;;  %v306_v18 = vsel %vm278_vm3, %v301_v35, %v1460_v0 }
  0x36   :  { %v148_v49 = vsel %vm104_vm2, %v143_v10, %v1477_v9  ;;  %v249_v26 = vrot.slane %v989_v48, 1  ;;  %v193_v7 = vshll.u32 %v989_v48, 16  ;;  %v374_v56 = vsel %vm363_vm0, %v371_v44, %v373_v14 }
  0x37   :  { %403 = vrot.lane.b32.xlu1 %v382_v25, %s1205_s26  ;;  %v330_v21 = vrot.slane %v328_v63, 1  ;;  %v333_v23 = vrot.slane %v331_v13, 2  ;;  %v191_v38 = vor.u32 %v189_v37, %v187_v61  ;;  %v385_v9 = vrot.slane %v991_v3, 2 }
  0x38   :  { %v250_v0 = vsel %vm227_vm1, %v247_v40, %v249_v26  ;;  %v195_v29 = vrot.slane %v193_v7, 1  ;;  %v197_v17 = vshrl.u32 %v989_v48, 16  ;;  %vm411_vm5 = vcmask 408576  }
  0x39   :  { %257 = vrot.lane.b32.xlu0 %v236_v41, %s1206_s27  ;;  %v334_v24 = vor.u32 %v333_v23, %v330_v21  ;;  %v386_v14 = vsel %vm363_vm0, %v383_v55, %v385_v9  ;;  %vm474_vm6 = vcmask 179200   ;;  %vm499_vm7 = vcmask 588800  }
  0x3a   :  { %v196_v22 = vsel %vm104_vm2, %v191_v38, %v195_v29  ;;  %v199_v30 = vor.u32 %v197_v17, %v195_v29  ;;  %vm651_vm8 = vcmask 998400   ;;  %vm437_vm9 = vcmask 818176  }
  0x3b   :  { %342 = vrot.lane.b32.xlu1 %v302_v32, %s1208_s6  ;;  %v335_v31 = vsel %vm278_vm3, %v325_v50, %v334_v24  ;;  %vm941_vm10 = vcmask 1041409   ;;  %vm944_vm11 = vcmask 1042434   ;;  %vm947_vm12 = vcmask 1043459  }
  0x3c   :  { %vm950_vm13 = vcmask 1044484   ;;  %vm953_vm14 = vcmask 1045509   ;;  %vm956_vm15 = vcmask 1046534   ;;  %vm959_vm0 = vcmask 1047559  }
  0x3d   :  { %206 = vrot.lane.b32.xlu0 %v140_v57, %s1207_s30 }
  0x3f   :  { %393 = vrot.lane.b32.xlu1 %v372_v27, %s1205_s26 }
  0x41   :  { %269 = vrot.lane.b32.xlu0 %v248_v59, %s1206_s27 }
  0x43   :  { %354 = vrot.lane.b32.xlu1 %v326_v62, %s1208_s6 }
  0x45   :  { %218 = vrot.lane.b32.xlu0 %v188_v4, %s1207_s30 }
  0x47   :  { %405 = vrot.lane.b32.xlu1 %v384_v47, %s1205_s26 }
  0x49   :  { %259 = vrot.lane.b32.xlu0 %v238_v15, %s1206_s27 }
  0x4b   :  { %344 = vrot.lane.b32.xlu1 %v306_v18, %s1208_s6 }
  0x4d   :  { %208 = vrot.lane.b32.xlu0 %v148_v49, %s1207_s30 }
  0x4f   :  { %395 = vrot.lane.b32.xlu1 %v374_v56, %s1205_s26 }
  0x51   :  { %271 = vrot.lane.b32.xlu0 %v250_v0, %s1206_s27 }
  0x53   :  { %356 = vrot.lane.b32.xlu1 %v335_v31, %s1208_s6 }
  0x55   :  { %220 = vrot.lane.b32.xlu0 %v196_v22, %s1207_s30 }
  0x57   :  { %407 = vrot.lane.b32.xlu1 %v386_v14, %s1205_s26 }
  0x59   :  { %261 = vrot.lane.b32.xlu0 %v1467_v54, %s1206_s27 }
  0x5b   :  { %346 = vrot.lane.b32.xlu1 %v1484_v11, %s1208_s6 }
  0x5d   :  { %210 = vrot.lane.b32.xlu0 %v1513_v16, %s1207_s30 }
  0x5f   :  { %397 = vrot.lane.b32.xlu1 %v1505_v20, %s1205_s26 }
  0x61   :  { %273 = vrot.lane.b32.xlu0 %v249_v26, %s1206_s27 }
  0x63   :  { %358 = vrot.lane.b32.xlu1 %v334_v24, %s1208_s6 }
  0x65   :  { %222 = vrot.lane.b32.xlu0 %v199_v30, %s1207_s30 }
  0x67   :  { %409 = vrot.lane.b32.xlu1 %v385_v9, %s1205_s26 }
  0x79   :  { %v388_v54 = vpop.permute.xlu1 %387 }
  0x7b   :  { %v252_v34 = vpop.permute.xlu0 %251 }
  0x7e   :  { %v201_v11 = vpop.permute.xlu1 %200 }
  0x7f   :  { %v264_v25 = vpop.permute.xlu0 %263  ;;  %v413_v16 = vsel %vm411_vm5, %v1253_v8, %v201_v11 }
  0x80   :  { %v439_v41 = vsel %vm437_vm9, %v413_v16, %v252_v34 }
  0x82   :  { %v349_v36 = vpop.permute.xlu1 %348 }
  0x83   :  { %v337_v20 = vpop.permute.xlu0 %336  ;;  %v488_v32 = vsel %vm474_vm6, %v264_v25, %v349_v36 }
  0x84   :  { %v476_v35 = vsel %vm474_vm6, %v252_v34, %v337_v20 }
  0x85   :  { %v501_v37 = vsel %vm499_vm7, %v476_v35, %v388_v54 }
  0x86   :  { %1009 = vmatprep.mubr.msk.bf16.mxu0 %vm651_vm8, %v501_v37  ;;  %v400_v8 = vpop.permute.xlu1 %399 }
  0x87   :  { %v213_v42 = vpop.permute.xlu0 %212  ;;  %713 = vmatmul.mubr.bf16.vlgmr.msra.gmra.mrb[0].mxu0 %v439_v41  ;;  %v513_v45 = vsel %vm499_vm7, %v488_v32, %v400_v8 }
  0x88   :  { %v425_v43 = vsel %vm411_vm5, %v1250_v6, %v213_v42  ;;  %1015 = vmatprep.mubr.msk.bf16.mxu1 %vm651_vm8, %v513_v45 }
  0x89   :  { %v457_v44 = vsel %vm437_vm9, %v425_v43, %v264_v25 }
  0x8a   :  { %761 = vmatmul.mubr.bf16.vlgmr.msra.gmra.mrb[0].mxu1 %v457_v44  ;;  %v339_v57 = vpop.permute.xlu1 %338 }
  0x8b   :  { %v254_v52 = vpop.permute.xlu0 %253 }
  0x8c   :  { %v478_v50 = vsel %vm474_vm6, %v254_v52, %v339_v57 }
  0x8e   :  { %v390_v58 = vpop.permute.xlu1 %389 }
  0x8f   :  { %v203_v40 = vpop.permute.xlu0 %202  ;;  %v503_v59 = vsel %vm499_vm7, %v478_v50, %v390_v58 }
  0x90   :  { %v415_v27 = vsel %vm411_vm5, %v1239_v2, %v203_v40  ;;  %1010 = vmatprep.mubr.msk.bf16.mxu0 %vm651_vm8, %v503_v59 }
  0x91   :  { %v442_v6 = vsel %vm437_vm9, %v415_v27, %v254_v52 }
  0x92   :  { %721 = vmatmul.mubr.bf16.gmra.mrb[4].mxu0 %v442_v6  ;;  %v351_v61 = vpop.permute.xlu1 %350 }
  0x93   :  { %v266_v60 = vpop.permute.xlu0 %265 }
  0x94   :  { %v490_v3 = vsel %vm474_vm6, %v266_v60, %v351_v61 }
  0x96   :  { %v402_v4 = vpop.permute.xlu1 %401 }
  0x97   :  { %v215_v62 = vpop.permute.xlu0 %214  ;;  %v515_v5 = vsel %vm499_vm7, %v490_v3, %v402_v4 }
  0x98   :  { %v427_v55 = vsel %vm411_vm5, %v1259_v12, %v215_v62  ;;  %1016 = vmatprep.mubr.msk.bf16.mxu1 %vm651_vm8, %v515_v5 }
  0x99   :  { %v460_v2 = vsel %vm437_vm9, %v427_v55, %v266_v60  ;;  %v988_v55 = vcombine.low %v1567_v46, %v1567_v46 }
  0x9a   :  { %769 = vmatmul.mubr.bf16.gmra.mrb[4].mxu1 %v460_v2 }
  0x9b   :  { %v256_v47 = vpop.permute.xlu0 %255 }
  0x9d   :  { %v341_v63 = vpop.permute.xlu1 %340 }
  0x9e   :  { %v480_v10 = vsel %vm474_vm6, %v256_v47, %v341_v63 }
  0x9f   :  { %v205_v13 = vpop.permute.xlu0 %204 }
  0xa0   :  { %v417_v15 = vsel %vm411_vm5, %v1289_v39, %v205_v13 }
  0xa1   :  { %v392_v48 = vpop.permute.xlu1 %391  ;;  %v445_v12 = vsel %vm437_vm9, %v417_v15, %v256_v47 }
  0xa2   :  { %v505_v18 = vsel %vm499_vm7, %v480_v10, %v392_v48 }
  0xa3   :  { %1011 = vmatprep.mubr.msk.bf16.mxu0 %vm651_vm8, %v505_v18  ;;  %v268_v21 = vpop.permute.xlu0 %267 }
  0xa4   :  { %729 = vmatmul.mubr.bf16.gmra.mrb[8].mxu0 %v445_v12 }
  0xa5   :  { %v353_v23 = vpop.permute.xlu1 %352 }
  0xa6   :  { %v492_v7 = vsel %vm474_vm6, %v268_v21, %v353_v23 }
  0xa7   :  { %v217_v49 = vpop.permute.xlu0 %216 }
  0xa8   :  { %v429_v26 = vsel %vm411_vm5, %v1305_v51, %v217_v49 }
  0xa9   :  { %v404_v56 = vpop.permute.xlu1 %403  ;;  %v463_v39 = vsel %vm437_vm9, %v429_v26, %v268_v21 }
  0xaa   :  { %v517_v24 = vsel %vm499_vm7, %v492_v7, %v404_v56 }
  0xab   :  { %1017 = vmatprep.mubr.msk.bf16.mxu1 %vm651_vm8, %v517_v24  ;;  %v258_v0 = vpop.permute.xlu0 %257 }
  0xac   :  { %777 = vmatmul.mubr.bf16.gmra.mrb[8].mxu1 %v463_v39 }
  0xad   :  { %v343_v38 = vpop.permute.xlu1 %342 }
  0xae   :  { %v482_v9 = vsel %vm474_vm6, %v258_v0, %v343_v38 }
  0xaf   :  { %v207_v29 = vpop.permute.xlu0 %206 }
  0xb0   :  { %v419_v31 = vsel %vm411_vm5, %v1361_v19, %v207_v29 }
  0xb1   :  { %v394_v22 = vpop.permute.xlu1 %393  ;;  %v448_v51 = vsel %vm437_vm9, %v419_v31, %v258_v0 }
  0xb2   :  { %v507_v14 = vsel %vm499_vm7, %v482_v9, %v394_v22 }
  0xb3   :  { %1012 = vmatprep.mubr.msk.bf16.mxu0 %vm651_vm8, %v507_v14  ;;  %v270_v17 = vpop.permute.xlu0 %269 }
  0xb4   :  { %737 = vmatmul.mubr.bf16.gmra.mrb[12].mxu0 %v448_v51 }
  0xb5   :  { %v355_v30 = vpop.permute.xlu1 %354 }
  0xb6   :  { %v494_v25 = vsel %vm474_vm6, %v270_v17, %v355_v30 }
  0xb7   :  { %v219_v54 = vpop.permute.xlu0 %218 }
  0xb8   :  { %v431_v34 = vsel %vm411_vm5, %v1387_v28, %v219_v54 }
  0xb9   :  { %v406_v11 = vpop.permute.xlu1 %405  ;;  %v466_v19 = vsel %vm437_vm9, %v431_v34, %v270_v17 }
  0xba   :  { %v519_v16 = vsel %vm499_vm7, %v494_v25, %v406_v11 }
  0xbb   :  { %1018 = vmatprep.mubr.msk.bf16.mxu1 %vm651_vm8, %v519_v16  ;;  %v260_v20 = vpop.permute.xlu0 %259 }
  0xbc   :  { %785 = vmatmul.mubr.bf16.gmra.mrb[12].mxu1 %v466_v19 }
  0xbd   :  { %v345_v35 = vpop.permute.xlu1 %344 }
  0xbe   :  { %v484_v41 = vsel %vm474_vm6, %v260_v20, %v345_v35 }
  0xbf   :  { %v209_v36 = vpop.permute.xlu0 %208 }
  0xc0   :  { %v421_v37 = vsel %vm411_vm5, %v1442_v53, %v209_v36 }
  0xc1   :  { %v396_v42 = vpop.permute.xlu1 %395  ;;  %v451_v28 = vsel %vm437_vm9, %v421_v37, %v260_v20 }
  0xc2   :  { %v509_v43 = vsel %vm499_vm7, %v484_v41, %v396_v42 }
  0xc3   :  { %1013 = vmatprep.mubr.msk.bf16.mxu0 %vm651_vm8, %v509_v43  ;;  %v272_v32 = vpop.permute.xlu0 %271 }
  0xc4   :  { %745 = vmatmul.mubr.bf16.gmra.mrb[16].mxu0 %v451_v28 }
  0xc5   :  { %v357_v8 = vpop.permute.xlu1 %356 }
  0xc6   :  { %v496_v52 = vsel %vm474_vm6, %v272_v32, %v357_v8 }
  0xc7   :  { %v221_v44 = vpop.permute.xlu0 %220 }
  0xc8   :  { %v433_v45 = vsel %vm411_vm5, %v1534_v1, %v221_v44 }
  0xc9   :  { %v408_v57 = vpop.permute.xlu1 %407  ;;  %v469_v53 = vsel %vm437_vm9, %v433_v45, %v272_v32 }
  0xca   :  { %v521_v40 = vsel %vm499_vm7, %v496_v52, %v408_v57 }
  0xcb   :  { %1019 = vmatprep.mubr.msk.bf16.mxu1 %vm651_vm8, %v521_v40  ;;  %v262_v27 = vpop.permute.xlu0 %261 }
  0xcc   :  { %793 = vmatmul.mubr.bf16.gmra.mrb[16].mxu1 %v469_v53 }
  0xcd   :  { %v347_v50 = vpop.permute.xlu1 %346 }
  0xce   :  { %v486_v59 = vsel %vm474_vm6, %v262_v27, %v347_v50 }
  0xcf   :  { %v211_v58 = vpop.permute.xlu0 %210 }
  0xd0   :  { %v423_v6 = vsel %vm411_vm5, %v1406_v33, %v211_v58 }
  0xd1   :  { %v398_v60 = vpop.permute.xlu1 %397  ;;  %v454_v1 = vsel %vm437_vm9, %v423_v6, %v262_v27  ;;  %v1703_v27 = vld [vmem:[%s1729_s2] ss:$0 sm:$0xff]  ;;  %s1209_s2 = smov [#allocation2]  }
  0xd2   :  { %v511_v61 = vsel %vm499_vm7, %v486_v59, %v398_v60  ;;  %s969_s27 = sshll.u32 %s1209_s2, 4  ;;  %s970_s27 = int_to_ptr.vmem [resolvable:$true] %s969_s27 }
  0xd3   :  { %1014 = vmatprep.mubr.msk.bf16.mxu0 %vm651_vm8, %v511_v61  ;;  %v274_v62 = vpop.permute.xlu0 %273  ;;  %s1181_s30 = scalar_lea.vmem %s970_s27, 128  ;;  %p1186_p1 = scmp.lt.s32.totalorder %s970_s27, %s970_s27 }
  0xd4   :  { %753 = vmatmul.mubr.bf16.gmra.mrb[20].mxu0 %v454_v1  ;;  %p1182_p0 = scmp.ne.s32.totalorder %s970_s27, %s1181_s30  ;;  %p1187_p2 = scmp.lt.s32.totalorder %s1181_s30, %s1181_s30 }
  0xd5   :  { %v359_v3 = vpop.permute.xlu1 %358 }
  0xd6   :  { %v498_v33 = vsel %vm474_vm6, %v274_v62, %v359_v3  ;;  %p1188_p3 = por %p1187_p2, %p1186_p1 }
  0xd7   :  { %v223_v4 = vpop.permute.xlu0 %222 }
  0xd8   :  { %v436_v2 = vsel %vm411_vm5, %v988_v55, %v223_v4  ;;  %p1189_p4 = pnand %p1188_p3, %p1182_p0 }
  0xd9   :  { %v410_v5 = vpop.permute.xlu1 %409  ;;  %v472_v47 = vsel %vm437_vm9, %v436_v2, %v274_v62 }
  0xda   :  { %v523_v63 = vsel %vm499_vm7, %v498_v33, %v410_v5 }
  0xdb   :  { %1020 = vmatprep.mubr.msk.bf16.mxu1 %vm651_vm8, %v523_v63 }
  0xdc   :  { %801 = vmatmul.mubr.bf16.gmra.mrb[20].mxu1 %v472_v47 }
 0x15a   :  { %v1038_v13 = vpop.f32.mrb[0].mxu0 }
 0x15b   :  { %v1039_v15 = vpop.f32.mrb[1].mxu0 }
 0x15c   :  { %v1040_v10 = vadd.f32 %v1039_v15, %v1038_v13  ;;  %v1041_v48 = vpop.f32.mrb[2].mxu0 }
 0x15d   :  { %v1042_v12 = vpop.f32.mrb[3].mxu0  ;;  %v1074_v18 = vpop.f32.mrb[0].mxu1 }
 0x15e   :  { %v1043_v46 = vadd.f32 %v1042_v12, %v1041_v48  ;;  %v1075_v23 = vpop.f32.mrb[1].mxu1 }
 0x15f   :  { %v1076_v49 = vadd.f32 %v1075_v23, %v1074_v18  ;;  %v1077_v26 = vpop.f32.mrb[2].mxu1 }
 0x160   :  { %v845_v21 = vmax.f32 %v1040_v10, %v1043_v46  ;;  %v1078_v7 = vpop.f32.mrb[3].mxu1 }
 0x161   :  { %v1079_v56 = vadd.f32 %v1078_v7, %v1077_v26 }
 0x162   :  { %v847_v51 = vrot.slane %v845_v21, 4 }
 0x163   :  { %v1698_v39 = vmax.f32 %v1076_v49, %v1079_v56 }
 0x164   :  { %v848_v54 = vmax.f32 %v845_v21, %v847_v51 }
 0x165   :  { %v1044_v24 = vpop.f32.mrb[4].mxu0 }
 0x166   :  { %v1045_v0 = vpop.f32.mrb[5].mxu0  ;;  %v849_v11 = vrot.slane %v848_v54, 2 }
 0x167   :  { %v1047_v38 = vpop.f32.mrb[6].mxu0 }
 0x168   :  { %v1048_v29 = vpop.f32.mrb[7].mxu0  ;;  %v850_v36 = vmax.f32 %v848_v54, %v849_v11 }
 0x169   :  { %v1049_v31 = vadd.f32 %v1048_v29, %v1047_v38 }
 0x16a   :  { %v851_v43 = vrot.slane %v850_v36, 1 }
 0x16c   :  { %v852_v53 = vmax.f32 %v850_v36, %v851_v43 }
 0x16d   :  { %v1080_v9 = vpop.f32.mrb[4].mxu1 }
 0x16e   :  { %v1081_v22 = vpop.f32.mrb[5].mxu1  ;;  %v916_v59 = vadd.f32 %v1703_v27, %v852_v53 }
 0x16f   :  { %v1083_v14 = vpop.f32.mrb[6].mxu1 }
 0x170   :  { %v1084_v17 = vpop.f32.mrb[7].mxu1 }
 0x171   :  { %v1085_v30 = vadd.f32 %v1084_v17, %v1083_v14 }
 0x177   :  { %v1050_v34 = vpop.f32.mrb[8].mxu0 }
 0x178   :  { %v1051_v25 = vpop.f32.mrb[9].mxu0 }
 0x179   :  { %v1052_v19 = vadd.f32 %v1051_v25, %v1050_v34  ;;  %v1053_v16 = vpop.f32.mrb[10].mxu0 }
 0x17a   :  { %v1054_v20 = vpop.f32.mrb[11].mxu0 }
 0x17b   :  { %v853_v35 = vmax.f32 %v1049_v31, %v1052_v19  ;;  %v879_v31 = vrot.slane %v1698_v39, 4 }
 0x17d   :  { %v855_v37 = vrot.slane %v853_v35, 4  ;;  %v880_v17 = vmax.f32 %v1698_v39, %v879_v31 }
 0x17f   :  { %v856_v41 = vmax.f32 %v853_v35, %v855_v37  ;;  %v1086_v42 = vpop.f32.mrb[8].mxu1  ;;  %v881_v19 = vrot.slane %v880_v17, 2 }
 0x180   :  { %v1087_v28 = vpop.f32.mrb[9].mxu1 }
 0x181   :  { %v857_v32 = vrot.slane %v856_v41, 2  ;;  %v1088_v8 = vadd.f32 %v1087_v28, %v1086_v42  ;;  %v1089_v44 = vpop.f32.mrb[10].mxu1  ;;  %v882_v42 = vmax.f32 %v880_v17, %v881_v19 }
 0x182   :  { %v1090_v45 = vpop.f32.mrb[11].mxu1 }
 0x183   :  { %v858_v52 = vmax.f32 %v856_v41, %v857_v32  ;;  %v885_v57 = vmax.f32 %v1085_v30, %v1088_v8 }
 0x185   :  { %v859_v40 = vrot.slane %v858_v52, 1  ;;  %v887_v9 = vrot.slane %v885_v57, 4 }
 0x187   :  { %v860_v50 = vmax.f32 %v858_v52, %v859_v40  ;;  %v1056_v58 = vpop.f32.mrb[12].mxu0  ;;  %v888_v54 = vmax.f32 %v885_v57, %v887_v9  ;;  %v883_v52 = vrot.slane %v882_v42, 1 }
 0x188   :  { %v1057_v6 = vpop.f32.mrb[13].mxu0 }
 0x189   :  { %v917_v60 = vadd.f32 %v1703_v27, %v860_v50  ;;  %v1058_v1 = vadd.f32 %v1057_v6, %v1056_v58  ;;  %v1059_v61 = vpop.f32.mrb[14].mxu0  ;;  %v889_v16 = vrot.slane %v888_v54, 2 }
 0x18a   :  { %v1060_v62 = vpop.f32.mrb[15].mxu0 }
 0x18b   :  { %1165 = vtanh.f32 %v917_v60  ;;  %v1061_v55 = vadd.f32 %v1060_v62, %v1059_v61  ;;  %v890_v32 = vmax.f32 %v888_v54, %v889_v16 }
 0x18c   :  { %1167 = vtanh.f32 %v916_v59  ;;  %v884_v59 = vmax.f32 %v882_v42, %v883_v52 }
 0x18d   :  { %v861_v3 = vmax.f32 %v1058_v1, %v1061_v55  ;;  %v891_v53 = vrot.slane %v890_v32, 1 }
 0x18f   :  { %v863_v4 = vrot.slane %v861_v3, 4  ;;  %v1092_v2 = vpop.f32.mrb[12].mxu1  ;;  %v892_v62 = vmax.f32 %v890_v32, %v891_v53 }
 0x190   :  { %v1093_v33 = vpop.f32.mrb[13].mxu1 }
 0x191   :  { %v864_v5 = vmax.f32 %v861_v3, %v863_v4  ;;  %v1094_v47 = vadd.f32 %v1093_v33, %v1092_v2  ;;  %v1095_v63 = vpop.f32.mrb[14].mxu1  ;;  %v920_v33 = vadd.f32 %v1703_v27, %v884_v59 }
 0x192   :  { %v1096_v13 = vpop.f32.mrb[15].mxu1 }
 0x193   :  { %v865_v15 = vrot.slane %v864_v5, 2  ;;  %v1097_v10 = vadd.f32 %v1096_v13, %v1095_v63  ;;  %v921_v63 = vadd.f32 %v1703_v27, %v892_v62 }
 0x195   :  { %v1166_v48 = vpop.eup %1165  ;;  %v866_v12 = vmax.f32 %v864_v5, %v865_v15  ;;  %v893_v46 = vmax.f32 %v1094_v47, %v1097_v10 }
 0x196   :  { %v940_v18 = vrot.slane %v1166_v48, 7  ;;  %v1168_v21 = vpop.eup %1167 }
 0x197   :  { %v867_v23 = vrot.slane %v866_v12, 1  ;;  %v1062_v49 = vpop.f32.mrb[16].mxu0  ;;  %v895_v51 = vrot.slane %v893_v46, 4 }
 0x198   :  { %v1063_v26 = vpop.f32.mrb[17].mxu0  ;;  %v942_v7 = vsel %vm941_vm10, %v940_v18, %v1168_v21 }
 0x199   :  { %v868_v56 = vmax.f32 %v866_v12, %v867_v23  ;;  %v1065_v24 = vpop.f32.mrb[18].mxu0  ;;  %v896_v11 = vmax.f32 %v893_v46, %v895_v51 }
 0x19a   :  { %v1066_v0 = vpop.f32.mrb[19].mxu0 }
 0x19b   :  { %v918_v38 = vadd.f32 %v1703_v27, %v868_v56  ;;  %v1067_v29 = vadd.f32 %v1066_v0, %v1065_v24  ;;  %v897_v37 = vrot.slane %v896_v11, 2 }
 0x19d   :  { %1169 = vtanh.f32 %v918_v38  ;;  %v898_v45 = vmax.f32 %v896_v11, %v897_v37 }
 0x19e   :  { %1171 = vtanh.f32 %v920_v33 }
 0x19f   :  { %v1098_v22 = vpop.f32.mrb[16].mxu1  ;;  %v899_v58 = vrot.slane %v898_v45, 1  ;;  %1173 = vtanh.f32 %v921_v63 }
 0x1a0   :  { %v1099_v14 = vpop.f32.mrb[17].mxu1 }
 0x1a1   :  { %v1101_v30 = vpop.f32.mrb[18].mxu1  ;;  %v900_v2 = vmax.f32 %v898_v45, %v899_v58 }
 0x1a2   :  { %v1102_v34 = vpop.f32.mrb[19].mxu1 }
 0x1a3   :  { %v1103_v25 = vadd.f32 %v1102_v34, %v1101_v30  ;;  %v922_v10 = vadd.f32 %v1703_v27, %v900_v2 }
 0x1a7   :  { %v1170_v20 = vpop.eup %1169  ;;  %v1068_v35 = vpop.f32.mrb[20].mxu0 }
 0x1a8   :  { %v943_v36 = vrot.slane %v1170_v20, 6  ;;  %v1069_v41 = vpop.f32.mrb[21].mxu0  ;;  %v1172_v49 = vpop.eup %1171 }
 0x1a9   :  { %v1070_v28 = vadd.f32 %v1069_v41, %v1068_v35  ;;  %v1071_v43 = vpop.f32.mrb[22].mxu0  ;;  %v1174_v26 = vpop.eup %1173  ;;  %v949_v0 = vrot.slane %v1172_v49, 4 }
 0x1aa   :  { %v1072_v8 = vpop.f32.mrb[23].mxu0  ;;  %v945_v44 = vsel %vm944_vm11, %v943_v36, %v942_v7 }
 0x1ab   :  { %v869_v39 = vmax.f32 %v1067_v29, %v1070_v28  ;;  %v952_v29 = vrot.slane %v1174_v26, 3 }
 0x1ad   :  { %v871_v57 = vrot.slane %v869_v39, 4 }
 0x1af   :  { %v872_v40 = vmax.f32 %v869_v39, %v871_v57  ;;  %v1104_v50 = vpop.f32.mrb[20].mxu1 }
 0x1b0   :  { %v1105_v6 = vpop.f32.mrb[21].mxu1 }
 0x1b1   :  { %v873_v60 = vrot.slane %v872_v40, 2  ;;  %v1106_v1 = vadd.f32 %v1105_v6, %v1104_v50  ;;  %v1107_v61 = vpop.f32.mrb[22].mxu1 }
 0x1b2   :  { %v1108_v55 = vpop.f32.mrb[23].mxu1 }
 0x1b3   :  { %v874_v3 = vmax.f32 %v872_v40, %v873_v60  ;;  %v901_v4 = vmax.f32 %v1103_v25, %v1106_v1 }
 0x1b5   :  { %v875_v5 = vrot.slane %v874_v3, 1  ;;  %v903_v47 = vrot.slane %v901_v4, 4 }
 0x1b7   :  { %v876_v13 = vmax.f32 %v874_v3, %v875_v5  ;;  %v904_v15 = vmax.f32 %v901_v4, %v903_v47 }
 0x1b9   :  { %v919_v48 = vadd.f32 %v1703_v27, %v876_v13  ;;  %v905_v12 = vrot.slane %v904_v15, 2 }
 0x1bb   :  { %1175 = vtanh.f32 %v919_v48  ;;  %v906_v46 = vmax.f32 %v904_v15, %v905_v12 }
 0x1bc   :  { %1177 = vtanh.f32 %v922_v10 }
 0x1bd   :  { %v907_v18 = vrot.slane %v906_v46, 1 }
 0x1bf   :  { %v908_v21 = vmax.f32 %v906_v46, %v907_v18 }
 0x1c1   :  { %v923_v23 = vadd.f32 %v1703_v27, %v908_v21 }
 0x1c3   :  { %1179 = vtanh.f32 %v923_v23 }
 0x1c5   :  { %v1176_v7 = vpop.eup %1175 }
 0x1c6   :  { %v1178_v56 = vpop.eup %1177  ;;  %v946_v24 = vrot.slane %v1176_v7, 5 }
 0x1c7   :  { %v955_v9 = vrot.slane %v1178_v56, 2 }
 0x1c8   :  { %v948_v38 = vsel %vm947_vm12, %v946_v24, %v945_v44 }
 0x1c9   :  { %v951_v31 = vsel %vm950_vm13, %v949_v0, %v948_v38 }
 0x1ca   :  { %v954_v22 = vsel %vm953_vm14, %v952_v29, %v951_v31 }
 0x1cb   :  { %v957_v51 = vsel %vm956_vm15, %v955_v9, %v954_v22 }
 0x1cd   :  { %v1180_v27 = vpop.eup %1179 }
 0x1ce   :  { %v958_v14 = vrot.slane %v1180_v27, 1 }
 0x1d0   :  { %v960_v17 = vsel %vm959_vm0, %v958_v14, %v957_v51 }
 0x1d1   :  { %962 = vst [vmem:[#allocation2] sm:$0xff] %v960_v17 }
 0x1d2   :  { %1192 = shalt.err (!%p1189_p4)
}
 0x1d3   :  { %s1193_s9 = scalar_lea.hbm %s1730_s3, 128 }
 0x1d4   :  { %p1194_p5 = scmp.ne.s32.totalorder %s1730_s3, %s1193_s9  ;;  %p1197_p6 = scmp.lt.u32.totalorder %s1193_s9, %s1730_s3 }
 0x1d6   :  { %p1199_p7 = pnand %p1197_p6, %p1194_p5 }
 0x1d8   :  { %1202 = shalt.err (!%p1199_p7)
}
 0x1d9   :  { %972 = dma.vmem_to_hbm [thread:$0]  %s970_s27, 128, %s1730_s3, [#allocation3]  }
 0x1da   :  { %1203 = dma.done.wait [#allocation3], 128  }
 0x1db   :  { %1204 = vsyncadd [#allocation3], 4294967168 }
 0x1dc   :  { %976 = vsyncpa [#allocation3], 1 }

</bundles_post_ra>
